<compile_context>
chip_gen: v7x
topology: tpu7x:2x2x1
jax: 0.10.0
libtpu: 0.0.40
codegen_flags: <defaults>
</compile_context>

<pallas_src>
import jax
import jax.numpy as jnp
import numpy as np
from jax.experimental import pallas as pl
from jax.experimental.pallas import tpu as pltpu


def _round_up(a, b):
    return (a + b - 1) // b * b


# ---------------------------------------------------------------------------
# Kernel 1: conv GEMM (single pass) + per-channel sum / sum-of-squares.
# ---------------------------------------------------------------------------
def _conv_stats_kernel(p_ref, w_ref, conv_ref, sum_ref, sumsq_ref):
    # p_ref:     (tm, Kp)  bf16 im2col patch tile
    # w_ref:     (Kp, Cp)  bf16 conv weight (pinned block)
    # conv_ref:  (tm, Cp)  bf16 un-normalized conv output tile
    # sum_ref:   (1, Cp)   f32 per-channel sum   (pinned output accumulator)
    # sumsq_ref: (1, Cp)   f32 per-channel sumsq (pinned output accumulator)
    mt = pl.program_id(0)

    acc = jnp.dot(p_ref[...], w_ref[...], preferred_element_type=jnp.float32)
    conv_ref[...] = acc.astype(conv_ref.dtype)

    @pl.when(mt == 0)
    def _init():
        sum_ref[...] = jnp.zeros_like(sum_ref)
        sumsq_ref[...] = jnp.zeros_like(sumsq_ref)

    # Zero-padded patch rows produce exactly-zero conv rows and contribute
    # nothing to the statistics, so no row mask is needed.
    sum_ref[...] += jnp.sum(acc, axis=0, keepdims=True)
    sumsq_ref[...] += jnp.sum(acc * acc, axis=0, keepdims=True)


# ---------------------------------------------------------------------------
# Kernel 2: BatchNorm affine + ReLU (pure element-wise pass).
# ---------------------------------------------------------------------------
def _bn_relu_kernel(conv_ref, scale_ref, shift_ref, o_ref):
    x = conv_ref[...].astype(jnp.float32)
    o_ref[...] = jnp.maximum(x * scale_ref[...] + shift_ref[...],
                             0.0).astype(o_ref.dtype)


def _pick_tile_m(m, kp, cp, budget_bytes):
    """Largest M tile whose double-buffered working set fits the budget."""
    # pinned weight + stats blocks (double-buffered by the pipeline)
    fixed = 2 * (kp * cp * 2 + 2 * cp * 4)
    # per M-row: patch tile (bf16) + conv output tile (bf16), double-buffered
    per_row = 2 * (kp * 2 + cp * 2)
    tm = max((budget_bytes - fixed) // per_row, 8)
    tm = min(tm, 1024)                      # amortizes ~0.35us per grid step
    m8 = _round_up(m, 8)
    if tm >= m8:
        return m8
    return max((tm // 8) * 8, 8)


def block_forward(x, w, gamma, beta, *, vmem_budget_bytes=32 * 1024 * 1024):
    """x: (N, Cin, H, W) f32, w: (Cout, Cin, 4, 4), gamma/beta: (Cout,)."""
    N, Cin, H, W = x.shape
    Cout = w.shape[0]
    Ho, Wo = H // 2, W // 2
    K = Cin * 16
    M = N * Ho * Wo

    # Lane-dense GEMM dims.
    Kp = _round_up(K, 128)
    Cp = 128 if Cout <= 128 else _round_up(Cout, 256)  # fill 256-wide MXU (v6e/v7x)

    tm = _pick_tile_m(M, Kp, Cp, vmem_budget_bytes)
    MT = pl.cdiv(M, tm)
    M_pad = MT * tm
    # TODO(synk): add a K grid axis (with an f32 VMEM accumulator) for very large
    # Cin (K = 16*Cin >~ 8192) instead of only shrinking tm.

    # ---- glue: reflect pad + im2col (Conv2d k=4, s=2, p=1, reflect) ----
    # TODO(synk): build patches in-kernel from a DMA'd padded-input row band
    # (memory_space=pl.ANY) to avoid materializing the im2col matrix in HBM.
    xp = jnp.pad(x, ((0, 0), (0, 0), (1, 1), (1, 1)), mode="reflect")
    cols = []
    for kh in range(4):
        for kw in range(4):
            cols.append(xp[:, :, kh:kh + 2 * Ho:2, kw:kw + 2 * Wo:2])  # (N,Cin,Ho,Wo)
    p = jnp.stack(cols, axis=-1)              # (N, Cin, Ho, Wo, 16)
    p = jnp.transpose(p, (0, 2, 3, 1, 4))     # (N, Ho, Wo, Cin, 16)
    patches = p.reshape(M, K)
    patches = jnp.pad(patches,
                      ((0, M_pad - M), (0, Kp - K))).astype(jnp.bfloat16)

    w_mat = jnp.pad(w.reshape(Cout, K).astype(jnp.float32),
                    ((0, Cp - Cout), (0, Kp - K)))
    w_mat = w_mat.T.astype(jnp.bfloat16)      # (Kp, Cp)

    vmem_limit = 48 * 1024 * 1024             # < 64 MiB/TC on v7x

    # ---- pass 1: conv GEMM + per-channel batch statistics (single GEMM) ----
    conv, csum, csumsq = pl.pallas_call(
        _conv_stats_kernel,
        out_shape=(
            jax.ShapeDtypeStruct((M_pad, Cp), jnp.bfloat16),
            jax.ShapeDtypeStruct((1, Cp), jnp.float32),
            jax.ShapeDtypeStruct((1, Cp), jnp.float32),
        ),
        grid_spec=pltpu.PrefetchScalarGridSpec(
            num_scalar_prefetch=0,
            grid=(MT,),
            in_specs=[
                pl.BlockSpec((tm, Kp), lambda mt: (mt, 0)),
                pl.BlockSpec((Kp, Cp), lambda mt: (0, 0)),
            ],
            out_specs=[
                pl.BlockSpec((tm, Cp), lambda mt: (mt, 0)),
                pl.BlockSpec((1, Cp), lambda mt: (0, 0)),   # pinned accumulator
                pl.BlockSpec((1, Cp), lambda mt: (0, 0)),   # pinned accumulator
            ]),
        compiler_params=pltpu.CompilerParams(
            dimension_semantics=("arbitrary",),   # stats accumulate across M tiles
            vmem_limit_bytes=vmem_limit),
    )(patches, w_mat)

    # ---- tiny BN finalize (PyTorch training-mode: biased variance, eps=1e-5) ----
    # TODO(synk): use a shifted / Welford-style combine if E[x^2]-mean^2
    # cancellation ever matters for very large N*Ho*Wo.
    gamma2 = jnp.pad(gamma.astype(jnp.float32), (0, Cp - Cout),
                     constant_values=1.0).reshape(1, Cp)
    beta2 = jnp.pad(beta.astype(jnp.float32), (0, Cp - Cout)).reshape(1, Cp)
    inv_m = jnp.float32(1.0 / M)
    mean = csum * inv_m
    var = jnp.maximum(csumsq * inv_m - mean * mean, 0.0)
    scale = gamma2 * jax.lax.rsqrt(var + 1e-5)
    shift = beta2 - mean * scale

    # ---- pass 2: normalize + ReLU (element-wise; M axis parallel for v7x) ----
    out = pl.pallas_call(
        _bn_relu_kernel,
        out_shape=jax.ShapeDtypeStruct((M_pad, Cp), jnp.float32),
        grid_spec=pltpu.PrefetchScalarGridSpec(
            num_scalar_prefetch=0,
            grid=(MT,),
            in_specs=[
                pl.BlockSpec((tm, Cp), lambda mt: (mt, 0)),
                pl.BlockSpec((1, Cp), lambda mt: (0, 0)),
                pl.BlockSpec((1, Cp), lambda mt: (0, 0)),
            ],
            out_specs=pl.BlockSpec((tm, Cp), lambda mt: (mt, 0))),
        compiler_params=pltpu.CompilerParams(
            dimension_semantics=("parallel",),
            vmem_limit_bytes=vmem_limit),
    )(conv, scale, shift)

    # use_dropout=False -> dropout is identity.
    # TODO(synk): training-mode Dropout(0.5) (use_dropout=True) would need pltpu.prng_*.
    # TODO(synk): ConvTranspose2d path (down=False) not implemented; spec default is down=True.
    y = out[:M, :Cout].reshape(N, Ho, Wo, Cout)
    # Keep the module's NCHW contract (drop this transpose if the caller takes NHWC).
    return jnp.transpose(y, (0, 3, 1, 2))


def reference_forward(x, w, gamma, beta):
    """Pure-JAX f32 reference (reflect-pad conv + training-mode BN + ReLU)."""
    xp = jnp.pad(x, ((0, 0), (0, 0), (1, 1), (1, 1)), mode="reflect")
    conv = jax.lax.conv_general_dilated(
        xp, w, window_strides=(2, 2), padding="VALID",
        dimension_numbers=("NCHW", "OIHW", "NCHW"))
    mean = jnp.mean(conv, axis=(0, 2, 3), keepdims=True)
    var = jnp.mean((conv - mean) ** 2, axis=(0, 2, 3), keepdims=True)
    g = gamma.reshape(1, -1, 1, 1)
    b = beta.reshape(1, -1, 1, 1)
    y = (conv - mean) * (g / jnp.sqrt(var + 1e-5)) + b
    return jnp.maximum(y, 0.0)


if __name__ == "__main__":
    key = jax.random.PRNGKey(0)
    k_x, k_w, k_g, k_b = jax.random.split(key, 4)

    N, Cin, H, W = 2, 4, 16, 16
    Cout = 8

    x = jax.random.normal(k_x, (N, Cin, H, W), dtype=jnp.float32)
    w = 0.1 * jax.random.normal(k_w, (Cout, Cin, 4, 4), dtype=jnp.float32)
    gamma = 1.0 + 0.1 * jax.random.normal(k_g, (Cout,), dtype=jnp.float32)
    beta = 0.1 * jax.random.normal(k_b, (Cout,), dtype=jnp.float32)

    out = jax.jit(block_forward)(x, w, gamma, beta)
    out = jax.block_until_ready(out)

    ref = reference_forward(x, w, gamma, beta)
    # bf16 matmul operands / bf16 conv intermediate vs f32 reference -> loose tol.
    np.testing.assert_allclose(np.asarray(out), np.asarray(ref), rtol=5e-2, atol=5e-2)
    assert out.shape == (N, Cout, H // 2, W // 2)

    print("KERNEL_OK")
</pallas_src>

<mosaic_0001>
module attributes {stable_mosaic.version = 11 : i64} {
  func.func @_conv_stats_kernel(%arg0: i32, %arg1: memref<128x128xbf16, #tpu.memory_space<vmem>>, %arg2: memref<128x128xbf16, #tpu.memory_space<vmem>>, %arg3: memref<128x128xbf16, #tpu.memory_space<vmem>>, %arg4: memref<1x128xf32, #tpu.memory_space<vmem>>, %arg5: memref<1x128xf32, #tpu.memory_space<vmem>>) attributes {dimension_semantics = [#tpu.dimension_semantics<arbitrary>], iteration_bounds = array<i64: 1>, scalar_prefetch = 0 : i64, scratch_operands = 0 : i64, tpu.core_type = #tpu.core_type<tc>, window_params = [{transform_indices = @transform_0, window_bounds = array<i64: 128, 128>}, {pipeline_mode = #tpu.pipeline_mode<synchronous>, transform_indices = @transform_1, window_bounds = array<i64: 128, 128>}, {transform_indices = @transform_2, window_bounds = array<i64: 128, 128>}, {pipeline_mode = #tpu.pipeline_mode<synchronous>, transform_indices = @transform_3, window_bounds = array<i64: 1, 128>}, {pipeline_mode = #tpu.pipeline_mode<synchronous>, transform_indices = @transform_4, window_bounds = array<i64: 1, 128>}]} {
    %c0 = arith.constant 0 : index
    %c0_0 = arith.constant 0 : index
    %0 = vector.load %arg1[%c0, %c0_0] : memref<128x128xbf16, #tpu.memory_space<vmem>>, vector<128x128xbf16>
    %c0_1 = arith.constant 0 : index
    %c0_2 = arith.constant 0 : index
    %1 = vector.load %arg2[%c0_1, %c0_2] : memref<128x128xbf16, #tpu.memory_space<vmem>>, vector<128x128xbf16>
    %cst = arith.constant dense<0.000000e+00> : vector<128x128xf32>
    %2 = tpu.matmul %0, %1, %cst {dimension_numbers = #tpu.dot_dimension_numbers<[1], [0], [0], [1], [0, 0, 1, 1], [], []>} : vector<128x128xbf16>, vector<128x128xbf16>, vector<128x128xf32> -> vector<128x128xf32>
    %3 = arith.truncf %2 : vector<128x128xf32> to vector<128x128xbf16>
    %c0_3 = arith.constant 0 : index
    %c0_4 = arith.constant 0 : index
    %4 = vector.load %arg3[%c0_3, %c0_4] : memref<128x128xbf16, #tpu.memory_space<vmem>>, vector<128x128xbf16>
    tpu.vector_store %arg3[%c0_3, %c0_4], %3 {strides = array<i32>} : memref<128x128xbf16, #tpu.memory_space<vmem>>, vector<128x128xbf16>,
    %c0_i32 = arith.constant 0 : i32
    %5 = arith.cmpi eq, %arg0, %c0_i32 : i32
    %6 = arith.extui %5 : i1 to i32
    %c0_i32_5 = arith.constant 0 : i32
    %7 = arith.cmpi ne, %6, %c0_i32_5 : i32
    scf.if %7 {
      %cst_16 = arith.constant 0.000000e+00 : f32
      %19 = vector.broadcast %cst_16 : f32 to vector<1x128xf32>
      %c0_17 = arith.constant 0 : index
      %c0_18 = arith.constant 0 : index
      %20 = vector.load %arg4[%c0_17, %c0_18] : memref<1x128xf32, #tpu.memory_space<vmem>>, vector<1x128xf32>
      tpu.vector_store %arg4[%c0_17, %c0_18], %19 {strides = array<i32>} : memref<1x128xf32, #tpu.memory_space<vmem>>, vector<1x128xf32>,
      %cst_19 = arith.constant 0.000000e+00 : f32
      %21 = vector.broadcast %cst_19 : f32 to vector<1x128xf32>
      %c0_20 = arith.constant 0 : index
      %c0_21 = arith.constant 0 : index
      %22 = vector.load %arg5[%c0_20, %c0_21] : memref<1x128xf32, #tpu.memory_space<vmem>>, vector<1x128xf32>
      tpu.vector_store %arg5[%c0_20, %c0_21], %21 {strides = array<i32>} : memref<1x128xf32, #tpu.memory_space<vmem>>, vector<1x128xf32>,
    } else {
    }
    %c0_6 = arith.constant 0 : index
    %c0_7 = arith.constant 0 : index
    %8 = vector.load %arg4[%c0_6, %c0_7] : memref<1x128xf32, #tpu.memory_space<vmem>>, vector<1x128xf32>
    %cst_8 = arith.constant dense<0.000000e+00> : vector<128xf32>
    %9 = vector.multi_reduction <add>, %2, %cst_8 [0] : vector<128x128xf32> to vector<128xf32>
    %10 = vector.shape_cast %9 : vector<128xf32> to vector<1x128xf32>
    %11 = arith.addf %8, %10 : vector<1x128xf32>
    %c0_9 = arith.constant 0 : index
    %c0_10 = arith.constant 0 : index
    %12 = vector.load %arg4[%c0_9, %c0_10] : memref<1x128xf32, #tpu.memory_space<vmem>>, vector<1x128xf32>
    tpu.vector_store %arg4[%c0_9, %c0_10], %11 {strides = array<i32>} : memref<1x128xf32, #tpu.memory_space<vmem>>, vector<1x128xf32>,
    %c0_11 = arith.constant 0 : index
    %c0_12 = arith.constant 0 : index
    %13 = vector.load %arg5[%c0_11, %c0_12] : memref<1x128xf32, #tpu.memory_space<vmem>>, vector<1x128xf32>
    %14 = arith.mulf %2, %2 : vector<128x128xf32>
    %cst_13 = arith.constant dense<0.000000e+00> : vector<128xf32>
    %15 = vector.multi_reduction <add>, %14, %cst_13 [0] : vector<128x128xf32> to vector<128xf32>
    %16 = vector.shape_cast %15 : vector<128xf32> to vector<1x128xf32>
    %17 = arith.addf %13, %16 : vector<1x128xf32>
    %c0_14 = arith.constant 0 : index
    %c0_15 = arith.constant 0 : index
    %18 = vector.load %arg5[%c0_14, %c0_15] : memref<1x128xf32, #tpu.memory_space<vmem>>, vector<1x128xf32>
    tpu.vector_store %arg5[%c0_14, %c0_15], %17 {strides = array<i32>} : memref<1x128xf32, #tpu.memory_space<vmem>>, vector<1x128xf32>,
    return
  }
  func.func @transform_0(%arg0: i32) -> (i32, i32) {
    %c0_i32 = arith.constant 0 : i32
    %c0_i32_0 = arith.constant 0 : i32
    return %arg0, %c0_i32 : i32, i32
  }
  func.func @transform_1(%arg0: i32) -> (i32, i32) {
    %c0_i32 = arith.constant 0 : i32
    %c0_i32_0 = arith.constant 0 : i32
    %c0_i32_1 = arith.constant 0 : i32
    return %c0_i32, %c0_i32_0 : i32, i32
  }
  func.func @transform_2(%arg0: i32) -> (i32, i32) {
    %c0_i32 = arith.constant 0 : i32
    %c0_i32_0 = arith.constant 0 : i32
    return %arg0, %c0_i32 : i32, i32
  }
  func.func @transform_3(%arg0: i32) -> (i32, i32) {
    %c0_i32 = arith.constant 0 : i32
    %c0_i32_0 = arith.constant 0 : i32
    %c0_i32_1 = arith.constant 0 : i32
    return %c0_i32, %c0_i32_0 : i32, i32
  }
  func.func @transform_4(%arg0: i32) -> (i32, i32) {
    %c0_i32 = arith.constant 0 : i32
    %c0_i32_0 = arith.constant 0 : i32
    %c0_i32_1 = arith.constant 0 : i32
    return %c0_i32, %c0_i32_0 : i32, i32
  }
}

module attributes {stable_mosaic.version = 11 : i64} {
  func.func @_bn_relu_kernel(%arg0: i32, %arg1: memref<128x128xbf16, #tpu.memory_space<vmem>>, %arg2: memref<1x128xf32, #tpu.memory_space<vmem>>, %arg3: memref<1x128xf32, #tpu.memory_space<vmem>>, %arg4: memref<128x128xf32, #tpu.memory_space<vmem>>) attributes {dimension_semantics = [#tpu.dimension_semantics<parallel>], iteration_bounds = array<i64: 1>, scalar_prefetch = 0 : i64, scratch_operands = 0 : i64, tpu.core_type = #tpu.core_type<tc>, window_params = [{transform_indices = @transform_0, window_bounds = array<i64: 128, 128>}, {pipeline_mode = #tpu.pipeline_mode<synchronous>, transform_indices = @transform_1, window_bounds = array<i64: 1, 128>}, {pipeline_mode = #tpu.pipeline_mode<synchronous>, transform_indices = @transform_2, window_bounds = array<i64: 1, 128>}, {transform_indices = @transform_3, window_bounds = array<i64: 128, 128>}]} {
    %c0 = arith.constant 0 : index
    %c0_0 = arith.constant 0 : index
    %0 = vector.load %arg1[%c0, %c0_0] : memref<128x128xbf16, #tpu.memory_space<vmem>>, vector<128x128xbf16>
    %1 = arith.extf %0 : vector<128x128xbf16> to vector<128x128xf32>
    %c0_1 = arith.constant 0 : index
    %c0_2 = arith.constant 0 : index
    %2 = vector.load %arg2[%c0_1, %c0_2] : memref<1x128xf32, #tpu.memory_space<vmem>>, vector<1x128xf32>
    %3 = vector.broadcast %2 : vector<1x128xf32> to vector<128x128xf32>
    %4 = arith.mulf %1, %3 : vector<128x128xf32>
    %c0_3 = arith.constant 0 : index
    %c0_4 = arith.constant 0 : index
    %5 = vector.load %arg3[%c0_3, %c0_4] : memref<1x128xf32, #tpu.memory_space<vmem>>, vector<1x128xf32>
    %6 = vector.broadcast %5 : vector<1x128xf32> to vector<128x128xf32>
    %7 = arith.addf %4, %6 : vector<128x128xf32>
    %cst = arith.constant 0.000000e+00 : f32
    %8 = vector.broadcast %cst : f32 to vector<128x128xf32>
    %9 = arith.maximumf %7, %8 : vector<128x128xf32>
    %c0_5 = arith.constant 0 : index
    %c0_6 = arith.constant 0 : index
    %10 = vector.load %arg4[%c0_5, %c0_6] : memref<128x128xf32, #tpu.memory_space<vmem>>, vector<128x128xf32>
    tpu.vector_store %arg4[%c0_5, %c0_6], %9 {strides = array<i32>} : memref<128x128xf32, #tpu.memory_space<vmem>>, vector<128x128xf32>,
    return
  }
  func.func @transform_0(%arg0: i32) -> (i32, i32) {
    %c0_i32 = arith.constant 0 : i32
    %c0_i32_0 = arith.constant 0 : i32
    return %arg0, %c0_i32 : i32, i32
  }
  func.func @transform_1(%arg0: i32) -> (i32, i32) {
    %c0_i32 = arith.constant 0 : i32
    %c0_i32_0 = arith.constant 0 : i32
    %c0_i32_1 = arith.constant 0 : i32
    return %c0_i32, %c0_i32_0 : i32, i32
  }
  func.func @transform_2(%arg0: i32) -> (i32, i32) {
    %c0_i32 = arith.constant 0 : i32
    %c0_i32_0 = arith.constant 0 : i32
    %c0_i32_1 = arith.constant 0 : i32
    return %c0_i32, %c0_i32_0 : i32, i32
  }
  func.func @transform_3(%arg0: i32) -> (i32, i32) {
    %c0_i32 = arith.constant 0 : i32
    %c0_i32_0 = arith.constant 0 : i32
    return %arg0, %c0_i32 : i32, i32
  }
}

</mosaic_0001>

<bundles_post_ra>
// kernel: block_forward.3
= control target key start
LH: loop header
LB: loop body
LE: loop exit
PB: predicated region body
PF: predicated region fallthrough
CT: control target
= control target key end

     0   :  { %s303_s0 = inlined_call_operand.vmem [shape: bf16[128,128], index: 0, kind: input, shape index: {}]   ;;  %s304_s1 = inlined_call_operand.vmem [shape: f32[1,128], index: 1, kind: input, shape index: {}]   ;;  %s305_s2 = inlined_call_operand.vmem [shape: f32[1,128], index: 2, kind: input, shape index: {}]   ;;  %s306_s3 = inlined_call_operand.vmem [shape: f32[128,128], index: 3, kind: output, shape index: {}]  }
   0x1   :  { %v131_v0 = vld [vmem:[%s303_s0] sm:$0xff]   ;;  %v162_v4 = vld [vmem:[%s303_s0 + $0x8] sm:$0xff]   ;;  %v163_v5 = vld [vmem:[%s303_s0 + $0x10] sm:$0xff]  }
   0x2   :  { %v195_v1 = vld [vmem:[%s304_s1] ss:$0 sm:$0xff]  ;;  %v132_v2 = vunpack.c.l.bf16 %v131_v0  ;;  %v133_v3 = vunpack.c.h.bf16 %v131_v0  ;;  %v164_v6 = vld [vmem:[%s303_s0 + $0x18] sm:$0xff]   ;;  %v136_v8 = vunpack.c.l.bf16 %v162_v4  ;;  %v137_v9 = vunpack.c.h.bf16 %v162_v4  ;;  %v166_v33 = vld [vmem:[%s303_s0 + $0x28] sm:$0xff]  }
   0x3   :  { %v209_v7 = vld [vmem:[%s305_s2] ss:$0 sm:$0xff]  ;;  %v140_v10 = vunpack.c.l.bf16 %v163_v5  ;;  %v141_v11 = vunpack.c.h.bf16 %v163_v5  ;;  %v144_v14 = vunpack.c.l.bf16 %v164_v6  ;;  %v145_v15 = vunpack.c.h.bf16 %v164_v6  ;;  %v167_v34 = vld [vmem:[%s303_s0 + $0x30] sm:$0xff]   ;;  %v168_v39 = vld [vmem:[%s303_s0 + $0x38] sm:$0xff]  }
   0x4   :  { %v53_v12 = vmul.f32 %v132_v2, %v195_v1  ;;  %v54_v13 = vmul.f32 %v133_v3, %v195_v1  ;;  %v55_v16 = vmul.f32 %v136_v8, %v195_v1  ;;  %v56_v17 = vmul.f32 %v137_v9, %v195_v1  ;;  %v165_v28 = vld [vmem:[%s303_s0 + $0x20] sm:$0xff]  }
   0x5   :  { %v57_v18 = vmul.f32 %v140_v10, %v195_v1  ;;  %v58_v19 = vmul.f32 %v141_v11, %v195_v1  ;;  %v59_v22 = vmul.f32 %v144_v14, %v195_v1  ;;  %v60_v23 = vmul.f32 %v145_v15, %v195_v1 }
   0x6   :  { %v76_v20 = vadd.f32 %v209_v7, %v53_v12  ;;  %v77_v21 = vadd.f32 %v209_v7, %v54_v13  ;;  %v78_v24 = vadd.f32 %v209_v7, %v55_v16  ;;  %v79_v25 = vadd.f32 %v209_v7, %v56_v17 }
   0x7   :  { %v80_v26 = vadd.f32 %v209_v7, %v57_v18  ;;  %v81_v27 = vadd.f32 %v209_v7, %v58_v19  ;;  %v82_v31 = vadd.f32 %v209_v7, %v59_v22  ;;  %v83_v32 = vadd.f32 %v209_v7, %v60_v23 }
   0x8   :  { %v92_v29 = vmax.f32 %v76_v20, 0.0  ;;  %v93_v30 = vmax.f32 %v77_v21, 0.0  ;;  %v94_v35 = vmax.f32 %v78_v24, 0.0  ;;  %v95_v36 = vmax.f32 %v79_v25, 0.0 }
   0x9   :  { %v96_v37 = vmax.f32 %v80_v26, 0.0  ;;  %v97_v38 = vmax.f32 %v81_v27, 0.0  ;;  %v98_v40 = vmax.f32 %v82_v31, 0.0  ;;  %v99_v41 = vmax.f32 %v83_v32, 0.0 }
   0xa   :  { %108 = vst [vmem:[%s306_s3] sm:$0xff] %v92_v29  ;;  %109 = vst [vmem:[%s306_s3 + $0x8] sm:$0xff] %v93_v30  ;;  %v148_v42 = vunpack.c.l.bf16 %v165_v28  ;;  %v149_v43 = vunpack.c.h.bf16 %v165_v28  ;;  %v152_v44 = vunpack.c.l.bf16 %v166_v33  ;;  %v153_v45 = vunpack.c.h.bf16 %v166_v33 }
   0xb   :  { %110 = vst [vmem:[%s306_s3 + $0x10] sm:$0xff] %v94_v35  ;;  %111 = vst [vmem:[%s306_s3 + $0x18] sm:$0xff] %v95_v36  ;;  %v156_v46 = vunpack.c.l.bf16 %v167_v34  ;;  %v157_v47 = vunpack.c.h.bf16 %v167_v34  ;;  %v160_v50 = vunpack.c.l.bf16 %v168_v39  ;;  %v161_v51 = vunpack.c.h.bf16 %v168_v39 }
   0xc   :  { %112 = vst [vmem:[%s306_s3 + $0x20] sm:$0xff] %v96_v37  ;;  %113 = vst [vmem:[%s306_s3 + $0x28] sm:$0xff] %v97_v38  ;;  %v61_v48 = vmul.f32 %v148_v42, %v195_v1  ;;  %v62_v49 = vmul.f32 %v149_v43, %v195_v1  ;;  %v63_v52 = vmul.f32 %v152_v44, %v195_v1 }
   0xd   :  { %114 = vst [vmem:[%s306_s3 + $0x30] sm:$0xff] %v98_v40  ;;  %115 = vst [vmem:[%s306_s3 + $0x38] sm:$0xff] %v99_v41  ;;  %v64_v53 = vmul.f32 %v153_v45, %v195_v1  ;;  %v65_v54 = vmul.f32 %v156_v46, %v195_v1  ;;  %v66_v55 = vmul.f32 %v157_v47, %v195_v1 }
   0xe   :  { %v84_v56 = vadd.f32 %v209_v7, %v61_v48  ;;  %v85_v57 = vadd.f32 %v209_v7, %v62_v49  ;;  %v67_v58 = vmul.f32 %v160_v50, %v195_v1  ;;  %v68_v59 = vmul.f32 %v161_v51, %v195_v1 }
   0xf   :  { %v86_v60 = vadd.f32 %v209_v7, %v63_v52  ;;  %v87_v61 = vadd.f32 %v209_v7, %v64_v53  ;;  %v88_v62 = vadd.f32 %v209_v7, %v65_v54  ;;  %v89_v63 = vadd.f32 %v209_v7, %v66_v55 }
  0x10   :  { %v100_v0 = vmax.f32 %v84_v56, 0.0  ;;  %v101_v2 = vmax.f32 %v85_v57, 0.0  ;;  %v90_v3 = vadd.f32 %v209_v7, %v67_v58  ;;  %v91_v4 = vadd.f32 %v209_v7, %v68_v59 }
  0x11   :  { %v102_v5 = vmax.f32 %v86_v60, 0.0  ;;  %v103_v6 = vmax.f32 %v87_v61, 0.0  ;;  %v104_v8 = vmax.f32 %v88_v62, 0.0  ;;  %v105_v9 = vmax.f32 %v89_v63, 0.0 }
  0x12   :  { %116 = vst [vmem:[%s306_s3 + $0x40] sm:$0xff] %v100_v0  ;;  %117 = vst [vmem:[%s306_s3 + $0x48] sm:$0xff] %v101_v2  ;;  %v106_v1 = vmax.f32 %v90_v3, 0.0  ;;  %v107_v10 = vmax.f32 %v91_v4, 0.0 }
  0x13   :  { %118 = vst [vmem:[%s306_s3 + $0x50] sm:$0xff] %v102_v5  ;;  %119 = vst [vmem:[%s306_s3 + $0x58] sm:$0xff] %v103_v6 }
  0x14   :  { %120 = vst [vmem:[%s306_s3 + $0x60] sm:$0xff] %v104_v8  ;;  %121 = vst [vmem:[%s306_s3 + $0x68] sm:$0xff] %v105_v9 }
  0x15   :  { %122 = vst [vmem:[%s306_s3 + $0x70] sm:$0xff] %v106_v1  ;;  %123 = vst [vmem:[%s306_s3 + $0x78] sm:$0xff] %v107_v10 }

// kernel: block_forward.2
= control target key start
LH: loop header
LB: loop body
LE: loop exit
PB: predicated region body
PF: predicated region fallthrough
CT: control target
= control target key end

     0   :  { %v578_v16 = vmov 0.0   ;;  %s694_s1 = inlined_call_operand.vmem [shape: bf16[128,128], index: 1, kind: input, shape index: {}]   ;;  %s695_s0 = inlined_call_operand.vmem [shape: bf16[128,128], index: 0, kind: input, shape index: {}]   ;;  %s696_s3 = inlined_call_operand.vmem [shape: f32[1,128], index: 3, kind: output, shape index: {1}]   ;;  %s697_s4 = inlined_call_operand.vmem [shape: f32[1,128], index: 4, kind: output, shape index: {2}]   ;;  %s698_s2 = inlined_call_operand.vmem [shape: bf16[128,128], index: 2, kind: output, shape index: {0}]  }
   0x1   :  { %v562_v0 = vld [vmem:[%s694_s1] sm:$0xff]   ;;  %v563_v1 = vld [vmem:[%s694_s1 + $0x8] sm:$0xff]   ;;  %v564_v2 = vld [vmem:[%s694_s1 + $0x10] sm:$0xff]   ;;  %324 = vst [vmem:[%s696_s3] sm:$0x1] %v578_v16 }
   0x2   :  { %513 = vmatprep.subr.bf16.mxu0 %v562_v0  ;;  %545 = vmatprep.subr.bf16.mxu1 %v562_v0  ;;  %v565_v3 = vld [vmem:[%s694_s1 + $0x18] sm:$0xff]   ;;  %v570_v4 = vld [vmem:[%s695_s0] sm:$0xff]   ;;  %v567_v7 = vld [vmem:[%s694_s1 + $0x28] sm:$0xff]   ;;  %325 = vst [vmem:[%s697_s4] sm:$0x1] %v578_v16 }
   0x3   :  { %514 = vmatpush3.bf16.msra.mxu0 %v562_v0  ;;  %553 = vmatpush3.bf16.msra.mxu1 %v562_v0  ;;  %v566_v5 = vld [vmem:[%s694_s1 + $0x20] sm:$0xff]   ;;  %v568_v8 = vld [vmem:[%s694_s1 + $0x30] sm:$0xff]   ;;  %v569_v9 = vld [vmem:[%s694_s1 + $0x38] sm:$0xff]  }
   0x4   :  { %515 = vmatprep.subr.bf16.mxu0 %v563_v1  ;;  %546 = vmatprep.subr.bf16.mxu1 %v563_v1  ;;  %v574_v6 = vld [vmem:[%s695_s0 + $0x20] sm:$0xff]   ;;  %v571_v10 = vld [vmem:[%s695_s0 + $0x8] sm:$0xff]   ;;  %v572_v12 = vld [vmem:[%s695_s0 + $0x10] sm:$0xff]  }
   0x5   :  { %529 = vmatprep.mubr.bf16.mxu0 %v570_v4  ;;  %537 = vmatprep.mubr.bf16.mxu1 %v574_v6  ;;  %v575_v11 = vld [vmem:[%s695_s0 + $0x28] sm:$0xff]   ;;  %v576_v13 = vld [vmem:[%s695_s0 + $0x30] sm:$0xff]   ;;  %v573_v14 = vld [vmem:[%s695_s0 + $0x18] sm:$0xff]  }
   0x6   :  { %v577_v15 = vld [vmem:[%s695_s0 + $0x38] sm:$0xff]  }
   0x7   :  { %516 = vmatpush3.bf16.msra.mxu0 %v563_v1  ;;  %554 = vmatpush3.bf16.msra.mxu1 %v563_v1 }
   0x8   :  { %517 = vmatprep.subr.bf16.mxu0 %v564_v2  ;;  %547 = vmatprep.subr.bf16.mxu1 %v564_v2 }
   0xb   :  { %518 = vmatpush3.bf16.msra.mxu0 %v564_v2  ;;  %555 = vmatpush3.bf16.msra.mxu1 %v564_v2 }
   0xc   :  { %519 = vmatprep.subr.bf16.mxu0 %v565_v3  ;;  %548 = vmatprep.subr.bf16.mxu1 %v565_v3 }
   0xf   :  { %520 = vmatpush3.bf16.msra.mxu0 %v565_v3  ;;  %556 = vmatpush3.bf16.msra.mxu1 %v565_v3 }
  0x10   :  { %521 = vmatprep.subr.bf16.mxu0 %v566_v5  ;;  %549 = vmatprep.subr.bf16.mxu1 %v566_v5 }
  0x13   :  { %522 = vmatpush3.bf16.msra.mxu0 %v566_v5  ;;  %557 = vmatpush3.bf16.msra.mxu1 %v566_v5 }
  0x14   :  { %523 = vmatprep.subr.bf16.mxu0 %v567_v7  ;;  %550 = vmatprep.subr.bf16.mxu1 %v567_v7 }
  0x17   :  { %524 = vmatpush3.bf16.msra.mxu0 %v567_v7  ;;  %558 = vmatpush3.bf16.msra.mxu1 %v567_v7 }
  0x18   :  { %525 = vmatprep.subr.bf16.mxu0 %v568_v8  ;;  %551 = vmatprep.subr.bf16.mxu1 %v568_v8 }
  0x1b   :  { %526 = vmatpush3.bf16.msra.mxu0 %v568_v8  ;;  %559 = vmatpush3.bf16.msra.mxu1 %v568_v8 }
  0x1c   :  { %527 = vmatprep.subr.bf16.mxu0 %v569_v9  ;;  %552 = vmatprep.subr.bf16.mxu1 %v569_v9 }
  0x1f   :  { %528 = vmatpush3.bf16.msra.mxu0 %v569_v9  ;;  %560 = vmatpush3.bf16.msra.mxu1 %v569_v9 }
  0x22   :  { %530 = vmatmul.mubr.bf16.vlgmr.msra.gmra.mrb[0].mxu0 %v571_v10  ;;  %538 = vmatmul.mubr.bf16.vlgmr.msra.gmra.mrb[0].mxu1 %v575_v11 }
  0x23   :  { %533 = vmatprep.mubr.bf16.mxu0 %v572_v12  ;;  %541 = vmatprep.mubr.bf16.mxu1 %v576_v13 }
  0x2a   :  { %534 = vmatmul.mubr.bf16.gmra.mrb[4].mxu0 %v573_v14  ;;  %542 = vmatmul.mubr.bf16.gmra.mrb[4].mxu1 %v577_v15 }
  0xf5   :  { %v531_v17 = vpop.f32.mrb[0].mxu0  ;;  %v539_v18 = vpop.f32.mrb[0].mxu1 }
  0xf6   :  { %v177_v19 = vpop.f32.mrb[1].mxu0  ;;  %v209_v20 = vpop.f32.mrb[1].mxu1  ;;  %v353_v32 = vmul.f32 %v531_v17, %v531_v17  ;;  %v361_v4 = vmul.f32 %v539_v18, %v539_v18 }
  0xf7   :  { %v532_v21 = vpop.f32.mrb[2].mxu0  ;;  %v540_v22 = vpop.f32.mrb[2].mxu1  ;;  %v351_v23 = vmul.f32 %v177_v19, %v177_v19  ;;  %v359_v62 = vmul.f32 %v209_v20, %v209_v20 }
  0xf8   :  { %v458_v24 = vpack.c.bf16 %v532_v21, %v531_v17  ;;  %v180_v25 = vpop.f32.mrb[3].mxu0  ;;  %v478_v26 = vpack.c.bf16 %v540_v22, %v539_v18  ;;  %v212_v27 = vpop.f32.mrb[3].mxu1  ;;  %v354_v35 = vmul.f32 %v532_v21, %v532_v21  ;;  %v362_v7 = vmul.f32 %v540_v22, %v540_v22 }
  0xf9   :  { %v453_v28 = vpack.c.bf16 %v180_v25, %v177_v19  ;;  %v327_v29 = vadd.f32 %v180_v25, %v177_v19  ;;  %v352_v30 = vmul.f32 %v180_v25, %v180_v25  ;;  %v473_v31 = vpack.c.bf16 %v212_v27, %v209_v20 }
  0xfa   :  { %490 = vst [vmem:[%s698_s2 + $0x8] sm:$0xff] %v458_v24   ;;  %494 = vst [vmem:[%s698_s2 + $0x28] sm:$0xff] %v478_v26   ;;  %v360_v3 = vmul.f32 %v212_v27, %v212_v27 }
  0xfb   :  { %454 = vst [vmem:[%s698_s2] sm:$0xff] %v453_v28   ;;  %v328_v33 = vadd.f32 %v531_v17, %v327_v29  ;;  %v367_v34 = vadd.f32 %v352_v30, %v351_v23  ;;  %493 = vst [vmem:[%s698_s2 + $0x20] sm:$0xff] %v473_v31  }
  0xfd   :  { %v368_v36 = vadd.f32 %v367_v34, %v353_v32  ;;  %v535_v37 = vpop.f32.mrb[4].mxu0  ;;  %v329_v38 = vadd.f32 %v532_v21, %v328_v33  ;;  %v543_v39 = vpop.f32.mrb[4].mxu1  ;;  %v326_v32 = vld [vmem:[%s696_s3] sm:$0x1] }
  0xfe   :  { %v193_v40 = vpop.f32.mrb[5].mxu0  ;;  %v225_v41 = vpop.f32.mrb[5].mxu1  ;;  %v357_v56 = vmul.f32 %v535_v37, %v535_v37  ;;  %v365_v16 = vmul.f32 %v543_v39, %v543_v39 }
  0xff   :  { %v330_v42 = vadd.f32 %v329_v38, %v193_v40  ;;  %v355_v43 = vmul.f32 %v193_v40, %v193_v40  ;;  %v369_v44 = vadd.f32 %v368_v36, %v354_v35  ;;  %v536_v45 = vpop.f32.mrb[6].mxu0  ;;  %v544_v46 = vpop.f32.mrb[6].mxu1  ;;  %v363_v10 = vmul.f32 %v225_v41, %v225_v41  ;;  %v350_v35 = vld [vmem:[%s697_s4] sm:$0x1] }
 0x100   :  { %v468_v47 = vpack.c.bf16 %v536_v45, %v535_v37  ;;  %v196_v48 = vpop.f32.mrb[7].mxu0  ;;  %v488_v49 = vpack.c.bf16 %v544_v46, %v543_v39  ;;  %v228_v50 = vpop.f32.mrb[7].mxu1  ;;  %v358_v59 = vmul.f32 %v536_v45, %v536_v45 }
 0x101   :  { %v370_v51 = vadd.f32 %v369_v44, %v355_v43  ;;  %v463_v52 = vpack.c.bf16 %v196_v48, %v193_v40  ;;  %v331_v53 = vadd.f32 %v330_v42, %v196_v48  ;;  %v356_v54 = vmul.f32 %v196_v48, %v196_v48 }
 0x102   :  { %492 = vst [vmem:[%s698_s2 + $0x18] sm:$0xff] %v468_v47   ;;  %496 = vst [vmem:[%s698_s2 + $0x38] sm:$0xff] %v488_v49   ;;  %v483_v55 = vpack.c.bf16 %v228_v50, %v225_v41  ;;  %v364_v15 = vmul.f32 %v228_v50, %v228_v50 }
 0x103   :  { %491 = vst [vmem:[%s698_s2 + $0x10] sm:$0xff] %v463_v52   ;;  %v332_v57 = vadd.f32 %v535_v37, %v331_v53  ;;  %v371_v58 = vadd.f32 %v370_v51, %v356_v54 }
 0x104   :  { %495 = vst [vmem:[%s698_s2 + $0x30] sm:$0xff] %v483_v55  }
 0x105   :  { %v372_v60 = vadd.f32 %v371_v58, %v357_v56  ;;  %v333_v61 = vadd.f32 %v536_v45, %v332_v57 }
 0x107   :  { %v334_v63 = vadd.f32 %v333_v61, %v209_v20  ;;  %v373_v0 = vadd.f32 %v372_v60, %v358_v59  ;;  %v366_v20 = vmul.f32 %v544_v46, %v544_v46 }
 0x109   :  { %v374_v1 = vadd.f32 %v373_v0, %v359_v62  ;;  %v335_v2 = vadd.f32 %v334_v63, %v212_v27 }
 0x10b   :  { %v336_v5 = vadd.f32 %v539_v18, %v335_v2  ;;  %v375_v6 = vadd.f32 %v374_v1, %v360_v3 }
 0x10d   :  { %v376_v8 = vadd.f32 %v375_v6, %v361_v4  ;;  %v337_v9 = vadd.f32 %v540_v22, %v336_v5 }
 0x10f   :  { %v338_v11 = vadd.f32 %v337_v9, %v225_v41  ;;  %v377_v12 = vadd.f32 %v376_v8, %v362_v7 }
 0x111   :  { %v378_v13 = vadd.f32 %v377_v12, %v363_v10  ;;  %v339_v14 = vadd.f32 %v338_v11, %v228_v50 }
 0x113   :  { %v340_v17 = vadd.f32 %v543_v39, %v339_v14  ;;  %v379_v19 = vadd.f32 %v378_v13, %v364_v15 }
 0x115   :  { %v341_v21 = vadd.f32 %v544_v46, %v340_v17  ;;  %v380_v23 = vadd.f32 %v379_v19, %v365_v16 }
 0x117   :  { %v342_v24 = vrot.slane %v341_v21, 4  ;;  %v381_v25 = vadd.f32 %v380_v23, %v366_v20 }
 0x119   :  { %v343_v26 = vadd.f32 %v342_v24, %v341_v21  ;;  %v382_v18 = vrot.slane %v381_v25, 4 }
 0x11b   :  { %v344_v27 = vrot.slane %v343_v26, 2  ;;  %v383_v28 = vadd.f32 %v382_v18, %v381_v25 }
 0x11d   :  { %v345_v29 = vadd.f32 %v344_v27, %v343_v26  ;;  %v384_v22 = vrot.slane %v383_v28, 2 }
 0x11f   :  { %v346_v30 = vrot.slane %v345_v29, 1  ;;  %v385_v31 = vadd.f32 %v384_v22, %v383_v28 }
 0x121   :  { %v347_v33 = vadd.f32 %v346_v30, %v345_v29  ;;  %v386_v34 = vrot.slane %v385_v31, 1 }
 0x123   :  { %v348_v36 = vadd.f32 %v347_v33, %v326_v32  ;;  %v387_v37 = vadd.f32 %v386_v34, %v385_v31 }
 0x125   :  { %349 = vst [vmem:[%s696_s3] sm:$0x1] %v348_v36  ;;  %v388_v38 = vadd.f32 %v387_v37, %v350_v35 }
 0x127   :  { %389 = vst [vmem:[%s697_s4] sm:$0x1] %v388_v38 }

</bundles_post_ra>
